<compile_context>
chip_gen: v6e
topology: v6e:2x2x1
jax: 0.10.0
libtpu: 0.0.40
codegen_flags: <defaults>
</compile_context>

<pallas_src>
import jax
import jax.numpy as jnp
from jax.experimental import pallas as pl
from jax.experimental.pallas import tpu as pltpu


def _make_siren_kernel(tb: int, c_in: int, use_vpu_mac: bool, mxu_bf16: bool):
    def kernel(x_ref, w_ref, b_ref, o_ref):
        # x_ref: (tb, C_in, tl)   w_ref: (C_out, C_in) f32 [omega-folded]
        # b_ref: (C_out, 1) f32   [omega-folded]          o_ref: (tb, C_out, tl)
        w = w_ref[...]
        b = b_ref[...]
        if use_vpu_mac:
            # Hoist the weight-column slices once per tile (JAX does not CSE
            # broadcast_in_dim; the lane broadcast itself happens at the multiply
            # and is hidden under the HBM-bound roofline for skinny channels).
            w_cols = [w[:, k:k + 1] for k in range(c_in)]
        elif mxu_bf16:
            w_mm = w.astype(jnp.bfloat16)
        else:
            w_mm = w

        for bi in range(tb):  # tb <= 8, static unroll
            if use_vpu_mac:
                # Skinny contraction: unrolled broadcast multiply-accumulate on the
                # VPU, avoiding MXU push/pop latency for a tiny (C_out x C_in) matmul.
                x = x_ref[bi].astype(jnp.float32)            # (C_in, tl)
                acc = w_cols[0] * x[0:1, :]
                for k in range(1, c_in):
                    acc = acc + w_cols[k] * x[k:k + 1, :]
            else:
                xb = x_ref[bi]
                if not mxu_bf16:
                    xb = xb.astype(jnp.float32)
                acc = jnp.dot(w_mm, xb, preferred_element_type=jnp.float32)
            o_ref[bi] = jnp.sin(acc + b).astype(o_ref.dtype)

    return kernel


def siren_layer(x, w, b, omega_0, *, target_step_bytes=4 << 20, min_grid_steps=4):
    """SirenLayer forward: y = sin(omega_0 * (W x + b)).

    x: [N, C_in, L]  float32 or bfloat16 (NCL, as a pointwise Conv1d / Linear)
    w: [C_in, C_out] float32
    b: [C_out] float32 or None
    omega_0: python float or scalar
    Returns y: [N, C_out, L] in x.dtype.
    """
    N, C_in, L = x.shape
    C_out = w.shape[1]
    out_dtype = x.dtype

    # ---- fold omega_0 into the parameters (exact: sin(o*(Wx+b)) == sin((oW)x + ob)) ----
    omega = jnp.asarray(omega_0, jnp.float32)
    w_eff = (omega * w.astype(jnp.float32)).T                        # (C_out, C_in)
    if b is None:
        b_eff = jnp.zeros((C_out, 1), jnp.float32)
    else:
        b_eff = (omega * b.astype(jnp.float32)).reshape(C_out, 1)    # (C_out, 1)

    x_isz = jnp.dtype(x.dtype).itemsize
    o_isz = jnp.dtype(out_dtype).itemsize
    col_bytes = C_in * x_isz + C_out * o_isz     # streamed x+y bytes per (batch, lane) column

    # ---- generation-aware VMEM budget (64 MiB physical on v7x, 128 MiB on v5e/v6e) ----
    try:
        vmem_phys = int(pltpu.get_tpu_info().vmem_capacity_bytes)
    except Exception:
        vmem_phys = 64 << 20                     # conservative (v7x-sized) fallback
    vmem_usable = (3 * vmem_phys) // 4           # ~48 MiB on v7x, ~96 MiB on v5e/v6e

    # ---- byte-budgeted tile selection: ~target_step_bytes of (x + out) per grid step ----
    step_budget = min(target_step_bytes, max(1 << 20, vmem_usable // 6))
    lane_budget = max(1, step_budget // col_bytes)

    if L <= lane_budget:
        tl = L
        # L alone is too short to hit the budget: also block over the batch dim.
        tb = int(min(N, 8, max(1, lane_budget // max(1, L))))
    else:
        tb = 1
        tl = min(L, max(512, (lane_budget // 512) * 512))

    # ---- guarantee enough grid steps so both v7x TensorCores get work and the
    #      DMA pipeline has iterations to overlap (shrink tb first, then tl) ----
    def n_steps(tb_, tl_):
        return pl.cdiv(N, tb_) * pl.cdiv(L, tl_)

    while tb > 1 and n_steps(tb, tl) < min_grid_steps:
        tb = max(1, tb // 2)
    while n_steps(tb, tl) < min_grid_steps and tl > 512:
        tl = max(512, ((pl.cdiv(tl, 2) + 127) // 128) * 128)   # keep 128-aligned lane tiles

    grid = (pl.cdiv(N, tb), pl.cdiv(L, tl))

    use_vpu_mac = C_in <= 8                                  # tiny contraction -> skip the MXU
    mxu_bf16 = (not use_vpu_mac) and (x.dtype == jnp.bfloat16)

    # ---- pipeline depth + VMEM limit from the actual block sizes ----
    x_tile_bytes = tb * C_in * tl * x_isz
    o_tile_bytes = tb * C_out * tl * o_isz
    step_bytes = x_tile_bytes + o_tile_bytes
    deep_pipe = step_bytes < (1 << 20) and (grid[0] * grid[1]) >= min_grid_steps
    n_buf = 3 if deep_pipe else 2
    pipe_mode = pl.Buffered(n_buf) if deep_pipe else None

    param_bytes = 4 * (C_out * C_in + C_out)
    vmem_need = n_buf * step_bytes + 2 * param_bytes + (2 << 20)
    vmem_limit = int(min(max(2 * vmem_need, 32 << 20), vmem_usable))
    vmem_limit = int(max(vmem_limit, vmem_need))

    def _stream_spec(shape, imap):
        if pipe_mode is not None:
            return pl.BlockSpec(shape, imap, pipeline_mode=pipe_mode)
        return pl.BlockSpec(shape, imap)

    cost = pl.CostEstimate(
        flops=2 * N * L * C_in * C_out,
        transcendentals=N * L * C_out,
        bytes_accessed=N * C_in * L * x_isz + N * C_out * L * o_isz
        + 4 * (C_in * C_out + C_out),
    )

    out = pl.pallas_call(
        _make_siren_kernel(tb, C_in, use_vpu_mac, mxu_bf16),
        out_shape=jax.ShapeDtypeStruct((N, C_out, L), out_dtype),
        grid_spec=pltpu.PrefetchScalarGridSpec(
            num_scalar_prefetch=0,
            grid=grid,
            in_specs=[
                # x tile: batch block on the leading dim, C_in on sublanes (full dim),
                # L on lanes (lane-dense, 128-aligned except when tl == L).
                _stream_spec((tb, C_in, tl), lambda n, l: (n, 0, l)),
                # omega-folded W^T, resident across the whole grid.
                pl.BlockSpec((C_out, C_in), lambda n, l: (0, 0)),
                # omega-folded bias column, resident.
                pl.BlockSpec((C_out, 1), lambda n, l: (0, 0)),
            ],
            out_specs=_stream_spec((tb, C_out, tl), lambda n, l: (n, 0, l)),
        ),
        compiler_params=pltpu.CompilerParams(
            dimension_semantics=("parallel", "parallel"),
            vmem_limit_bytes=vmem_limit,
        ),
        cost_estimate=cost,
    )(x, w_eff, b_eff)

    return out  # [N, C_out, L]


if __name__ == "__main__":
    omega_0 = 30.0
    key = jax.random.PRNGKey(0)

    def reference(x, w, b, *, fold_w_to_bf16=False):
        x32 = x.astype(jnp.float32)
        w_fold = omega_0 * w.astype(jnp.float32)
        if fold_w_to_bf16:
            # Mirror the kernel's bf16 MXU weight rounding so the check isolates real
            # bugs rather than expected bf16 quantization of the folded weights.
            w_fold = w_fold.astype(jnp.bfloat16).astype(jnp.float32)
        b_fold = omega_0 * b.astype(jnp.float32)
        z = jnp.einsum("ncl,co->nol", x32, w_fold,
                       precision=jax.lax.Precision.HIGHEST)
        return jnp.sin(z + b_fold[None, :, None])

    def run_case(case_key, N, C_in, C_out, L, *, dtype=jnp.float32,
                 atol=2e-3, rtol=2e-3, match_bf16_weights=False):
        kx, kw, kb = jax.random.split(case_key, 3)
        bound = 1.0 / (C_in ** 0.5)
        x = jax.random.normal(kx, (N, C_in, L), dtype=jnp.float32).astype(dtype)
        w = jax.random.uniform(kw, (C_in, C_out), minval=-bound, maxval=bound,
                               dtype=jnp.float32)
        b = jax.random.uniform(kb, (C_out,), minval=-bound, maxval=bound,
                               dtype=jnp.float32)

        y = jax.block_until_ready(siren_layer(x, w, b, omega_0))
        y_ref = reference(x, w, b, fold_w_to_bf16=match_bf16_weights)
        assert y.shape == (N, C_out, L)
        assert y.dtype == dtype
        y32 = y.astype(jnp.float32)
        max_err = float(jnp.max(jnp.abs(y32 - y_ref)))
        assert jnp.allclose(y32, y_ref, atol=atol, rtol=rtol), (
            f"mismatch N={N} C_in={C_in} C_out={C_out} L={L} "
            f"dtype={dtype} max_err={max_err}"
        )

    keys = jax.random.split(key, 6)
    # Toy SirenLayer config (VPU broadcast-MAC path, single full-L tile per batch).
    run_case(keys[0], N=2, C_in=4, C_out=8, L=16)
    # Lane-tiled over L with a ragged masked tail and 3-deep (Buffered) pipelining.
    run_case(keys[1], N=1, C_in=4, C_out=8, L=5000)
    # Batch-blocked (tb > 1) with a ragged final batch block.
    run_case(keys[2], N=9, C_in=4, C_out=8, L=16)
    # Wide-channel config exercising the f32 MXU dot path.
    run_case(keys[3], N=1, C_in=128, C_out=128, L=256)
    # bf16 I/O on the skinny/VPU path (f32 math in-kernel, bf16 output rounding only).
    run_case(keys[4], N=2, C_in=4, C_out=8, L=384,
             dtype=jnp.bfloat16, atol=1.5e-2, rtol=0.0)
    # bf16 I/O + native bf16 MXU dot (f32 accumulation) on the wide path.
    run_case(keys[5], N=1, C_in=64, C_out=64, L=256,
             dtype=jnp.bfloat16, atol=1e-2, rtol=0.0,
             match_bf16_weights=True)

    print("KERNEL_OK")
</pallas_src>

<mosaic_0001>
module attributes {stable_mosaic.version = 11 : i64} {
  func.func @kernel(%arg0: i32, %arg1: i32, %arg2: memref<1x4x16xf32, #tpu.memory_space<vmem>>, %arg3: memref<8x4xf32, #tpu.memory_space<vmem>>, %arg4: memref<8x1xf32, #tpu.memory_space<vmem>>, %arg5: memref<1x8x16xf32, #tpu.memory_space<vmem>>) attributes {dimension_semantics = [#tpu.dimension_semantics<parallel>, #tpu.dimension_semantics<parallel>], iteration_bounds = array<i64: 2, 1>, scalar_prefetch = 0 : i64, scratch_operands = 0 : i64, tpu.core_type = #tpu.core_type<tc>, window_params = [{transform_indices = @transform_0, window_bounds = array<i64: 1, 4, 16>}, {pipeline_mode = #tpu.pipeline_mode<synchronous>, transform_indices = @transform_1, window_bounds = array<i64: 8, 4>}, {pipeline_mode = #tpu.pipeline_mode<synchronous>, transform_indices = @transform_2, window_bounds = array<i64: 8, 1>}, {transform_indices = @transform_3, window_bounds = array<i64: 1, 8, 16>}]} {
    %c0 = arith.constant 0 : index
    %c0_0 = arith.constant 0 : index
    %0 = vector.load %arg3[%c0, %c0_0] : memref<8x4xf32, #tpu.memory_space<vmem>>, vector<8x4xf32>
    %c0_1 = arith.constant 0 : index
    %c0_2 = arith.constant 0 : index
    %1 = vector.load %arg4[%c0_1, %c0_2] : memref<8x1xf32, #tpu.memory_space<vmem>>, vector<8x1xf32>
    %2 = vector.extract_strided_slice %0 {offsets = [0, 0], sizes = [8, 1], strides = [1, 1]} : vector<8x4xf32> to vector<8x1xf32>
    %3 = vector.extract_strided_slice %0 {offsets = [0, 1], sizes = [8, 1], strides = [1, 1]} : vector<8x4xf32> to vector<8x1xf32>
    %4 = vector.extract_strided_slice %0 {offsets = [0, 2], sizes = [8, 1], strides = [1, 1]} : vector<8x4xf32> to vector<8x1xf32>
    %5 = vector.extract_strided_slice %0 {offsets = [0, 3], sizes = [8, 1], strides = [1, 1]} : vector<8x4xf32> to vector<8x1xf32>
    %c0_3 = arith.constant 0 : index
    %c0_4 = arith.constant 0 : index
    %c0_5 = arith.constant 0 : index
    %6 = vector.load %arg2[%c0_3, %c0_4, %c0_5] : memref<1x4x16xf32, #tpu.memory_space<vmem>>, vector<1x4x16xf32>
    %7 = vector.shape_cast %6 : vector<1x4x16xf32> to vector<4x16xf32>
    %8 = vector.extract_strided_slice %7 {offsets = [0, 0], sizes = [1, 16], strides = [1, 1]} : vector<4x16xf32> to vector<1x16xf32>
    %9 = vector.broadcast %2 : vector<8x1xf32> to vector<8x16xf32>
    %10 = vector.broadcast %8 : vector<1x16xf32> to vector<8x16xf32>
    %11 = arith.mulf %9, %10 : vector<8x16xf32>
    %12 = vector.extract_strided_slice %7 {offsets = [1, 0], sizes = [1, 16], strides = [1, 1]} : vector<4x16xf32> to vector<1x16xf32>
    %13 = vector.broadcast %3 : vector<8x1xf32> to vector<8x16xf32>
    %14 = vector.broadcast %12 : vector<1x16xf32> to vector<8x16xf32>
    %15 = arith.mulf %13, %14 : vector<8x16xf32>
    %16 = arith.addf %11, %15 : vector<8x16xf32>
    %17 = vector.extract_strided_slice %7 {offsets = [2, 0], sizes = [1, 16], strides = [1, 1]} : vector<4x16xf32> to vector<1x16xf32>
    %18 = vector.broadcast %4 : vector<8x1xf32> to vector<8x16xf32>
    %19 = vector.broadcast %17 : vector<1x16xf32> to vector<8x16xf32>
    %20 = arith.mulf %18, %19 : vector<8x16xf32>
    %21 = arith.addf %16, %20 : vector<8x16xf32>
    %22 = vector.extract_strided_slice %7 {offsets = [3, 0], sizes = [1, 16], strides = [1, 1]} : vector<4x16xf32> to vector<1x16xf32>
    %23 = vector.broadcast %5 : vector<8x1xf32> to vector<8x16xf32>
    %24 = vector.broadcast %22 : vector<1x16xf32> to vector<8x16xf32>
    %25 = arith.mulf %23, %24 : vector<8x16xf32>
    %26 = arith.addf %21, %25 : vector<8x16xf32>
    %27 = vector.broadcast %1 : vector<8x1xf32> to vector<8x16xf32>
    %28 = arith.addf %26, %27 : vector<8x16xf32>
    %29 = math.sin %28 : vector<8x16xf32>
    %c0_6 = arith.constant 0 : index
    %c0_7 = arith.constant 0 : index
    %c0_8 = arith.constant 0 : index
    %30 = vector.load %arg5[%c0_6, %c0_7, %c0_8] : memref<1x8x16xf32, #tpu.memory_space<vmem>>, vector<1x8x16xf32>
    %31 = vector.shape_cast %30 : vector<1x8x16xf32> to vector<8x16xf32>
    %32 = vector.shape_cast %29 : vector<8x16xf32> to vector<1x8x16xf32>
    tpu.vector_store %arg5[%c0_6, %c0_7, %c0_8], %32 {strides = array<i32>} : memref<1x8x16xf32, #tpu.memory_space<vmem>>, vector<1x8x16xf32>,
    return
  }
  func.func @transform_0(%arg0: i32, %arg1: i32) -> (i32, i32, i32) {
    %c0_i32 = arith.constant 0 : i32
    %c0_i32_0 = arith.constant 0 : i32
    return %arg0, %c0_i32, %arg1 : i32, i32, i32
  }
  func.func @transform_1(%arg0: i32, %arg1: i32) -> (i32, i32) {
    %c0_i32 = arith.constant 0 : i32
    %c0_i32_0 = arith.constant 0 : i32
    %c0_i32_1 = arith.constant 0 : i32
    return %c0_i32, %c0_i32_0 : i32, i32
  }
  func.func @transform_2(%arg0: i32, %arg1: i32) -> (i32, i32) {
    %c0_i32 = arith.constant 0 : i32
    %c0_i32_0 = arith.constant 0 : i32
    %c0_i32_1 = arith.constant 0 : i32
    return %c0_i32, %c0_i32_0 : i32, i32
  }
  func.func @transform_3(%arg0: i32, %arg1: i32) -> (i32, i32, i32) {
    %c0_i32 = arith.constant 0 : i32
    %c0_i32_0 = arith.constant 0 : i32
    return %arg0, %c0_i32, %arg1 : i32, i32, i32
  }
}

</mosaic_0001>

<bundles_post_ra>
// kernel: tpu_custom_call.1
= control target key start
LH: loop header
LB: loop body
LE: loop exit
PB: predicated region body
PF: predicated region fallthrough
CT: control target
= control target key end

     0   :  { %8 = vsyncpa [#allocation3], 0  ;;  %s767_s0 = inlined_call_operand.vmem [shape: f32[2,4,16], index: 0, kind: input, shape index: {}]   ;;  %s768_s1 = inlined_call_operand.vmem [shape: f32[8,4], index: 1, kind: input, shape index: {}]   ;;  %s769_s2 = inlined_call_operand.vmem [shape: f32[8,1], index: 2, kind: input, shape index: {}]   ;;  %s770_s3 = inlined_call_operand.hbm [shape: f32[2,8,16], index: 3, kind: output, shape index: {}]  }
   0x1   :  { %10 = vsyncpa [#allocation3 + $0x1], 0  ;;  %s635_s12 = smov 0   ;;  %s637_s13 = smov 0  }
   0x2   :  { %s639_s14 = smov 0   ;;  %s641_s15 = smov 0  }
   0x3   :  { %s643_s16 = smov 0   ;;  %s645_s17 = smov 0  }
   0x4 LB: > { %s432_s18 = sadd.s32 4294967295, %s602_s17   ;;  %s433_s19 = sadd.s32 4294967294, %s602_s17   ;;  %s602_s17 = sphi %s645_s17, %s16_s17   ;;  %s598_s16 = sphi %s643_s16, %s777_s16   ;;  %s594_s15 = sphi %s641_s15, %s776_s15   ;;  %s590_s14 = sphi %s639_s14, %s775_s14   ;;  %s586_s13 = sphi %s637_s13, %s774_s13   ;;  %s582_s12 = sphi %s635_s12, %s773_s12  }
   0x5   : > { %s28_s20 = sadd.s32 1, %s598_s16  ;;  %s107_s21 = sadd.s32 1, %s590_s14 }
   0x6   : > { %p30_p0 = scmp.ge.s32.totalorder %s28_s20, 2  ;;  %p117_p1 = scmp.ne.s32.totalorder %s590_s14, %s586_s13 }
   0x7   : > { %p118_p2 = scmp.eq.s32.totalorder %s432_s18, 1  ;;  %p123_p3 = scmp.ne.s32.totalorder %s586_s13, %s582_s12 }
   0x8   : > { %s779_s20 = smov (%p30_p0, %s28_s20), 0  ;;  %p124_p5 = scmp.eq.s32.totalorder %s433_s19, 1 }
   0x9   : > { %p675_p4 = por %p118_p2, %p117_p1  ;;  %s102_s23 = ssub.s32 %s598_s16, %s779_s20 }
   0xa   : > { %p436_p6 = scmp.ge.s32.totalorder %s602_s17, 1  ;;  %p105_p7 = scmp.eq.s32.totalorder %s102_s23, 0 }
   0xb   : > { %p682_p8 = por %p124_p5, %p123_p3  ;;  %p158_p9 = scmp.lt.s32.totalorder %s602_s17, 3 }
   0xc   : > { %s688_s25 = scalar_select %p105_p7, %s590_s14, %s107_s21  }
   0xd   : > { %p159_p10 = pnand %p436_p6, %p158_p9 }
   0xe   : > { %p184_p11 = scmp.lt.s32.totalorder (!%p159_p10), %s594_s15, 1  ;;  %s181_s8 = sand.u32 (!%p159_p10), 1, %s586_s13  }
   0xf   : > { %162 = sbr.rel (%p159_p10) target bundleno = 256 (0x100), region = 32  ;;  %s437_s9 = sshll.u32 (!%p159_p10), %s181_s8, 3 }
  0x10   : > { %s444_s10 = sshll.u32 (!%p159_p10), %s594_s15, 7  ;;  %s183_s11 = scalar_lea.vmem (!%p159_p10), [#allocation2], %s437_s9 }
  0x11   : > { %s361_s18 = sshll.u32 (!%p159_p10), %s183_s11, 4  ;;  %s727_s23 = scalar_lea.hbm (!%p159_p10), %s770_s3, %s444_s10  ;;  %s362_s18 = int_to_ptr.vmem [resolvable:$true] %s361_s18 }
  0x12   : > { %s526_s26 = scalar_lea.vmem (!%p159_p10), %s362_s18, 128  ;;  %s614_s27 = smov (!%p159_p10), [#allocation2]  }
  0x13   : > { %p527_p12 = scmp.ne.s32.totalorder (!%p159_p10), %s362_s18, %s526_s26  ;;  %s530_s28 = sshll.u32 (!%p159_p10), %s614_s27, 4  ;;  %s531_s28 = int_to_ptr.vmem [resolvable:$false] %s530_s28 }
  0x14   : > { %v191_v0 = vld [vmem:[%s768_s1] sm:$0xff]  ;;  %v604_v1 = vmov 0   ;;  %v605_v2 = vmov 2   ;;  %v606_v3 = vmov 1   ;;  %v607_v4 = vmov 3   ;;  %s185_s30 = scalar_select %p184_p11, %s594_s15, 1 }
  0x15   : > { %516 = vset.pattern.permute.xlu0 %v604_v1  ;;  %518 = vset.pattern.permute.xlu1 %v605_v2  ;;  %v192_v5 = vld [vmem:[%s769_s2] sm:$0xff]  ;;  %v199_v6 = vlaneseq  ;;  %v608_v40 = vmov 683565275   ;;  %v609_v42 = vmov 2475754826   ;;  %vm344_vm12 = vcmask 130048   ;;  %p528_p13 = pnand %p527_p12, %p675_p4  ;;  %p533_p1 = scmp.lt.s32.totalorder %s362_s18, %s531_s28 }
  0x16   : > { %196 = vperm.xlu0 %516, %v191_v0   ;;  %215 = vperm.xlu1 %518, %v191_v0   ;;  %s438_s4 = sshll.u32 %s185_s30, 2  ;;  %v610_v45 = vmov 2131351028   ;;  %v611_v48 = vmov 2102212464   ;;  %s347_s15 = scalar_lea.sflag [#allocation3], %s181_s8 }
  0x17   : > { %v200_v7 = vshrl.u32 %v199_v6, 7  ;;  %s190_s7 = scalar_lea.vmem %s767_s0, %s438_s4  ;;  %v612_v51 = vmov 920167782   ;;  %v613_v54 = vmov 1326507024   ;;  %p529_p0 = pneg %p528_p13 }
  0x18   : > { %v193_v10 = vld [vmem:[%s190_s7] sm:$0xf]  ;;  %s532_s29 = scalar_lea.vmem %s531_s28, 256 }
  0x19   : > { %v201_v8 = vsub.s32 0, %v200_v7  ;;  %v210_v9 = vsub.s32 1, %v200_v7  ;;  %v220_v12 = vsub.s32 2, %v200_v7  ;;  %v230_v14 = vsub.s32 3, %v200_v7  ;;  %p534_p2 = scmp.lt.s32.totalorder %s532_s29, %s526_s26 }
  0x1a   : > { %517 = vset.pattern.permute.xlu0 %v606_v3  ;;  %519 = vset.pattern.permute.xlu1 %v607_v4 }
  0x1b   : > { %205 = vperm.xlu0 %517, %v191_v0   ;;  %225 = vperm.xlu1 %519, %v191_v0   ;;  %v202_v15 = vrot.slane %v193_v10, %v201_v8  ;;  %v211_v16 = vrot.slane %v193_v10, %v210_v9  ;;  %v221_v17 = vrot.slane %v193_v10, %v220_v12  ;;  %p535_p3 = por %p534_p2, %p533_p1 }
  0x1c   : > { %v231_v18 = vrot.slane %v193_v10, %v230_v14 }
  0x1d   : > { %p536_p5 = pnand %p535_p3, %p529_p0 }
  0x1f   : > { %520 = vset.pattern.permute.xlu1 %v604_v1  ;;  %521 = vset.pattern.permute.xlu0 %v604_v1 }
  0x20   : > { %236 = vperm.xlu1 %520, %v192_v5  }
  0x91   : > { %v197_v11 = vpop.permute.xlu0 %196  ;;  %v216_v13 = vpop.permute.xlu1 %215 }
  0x92   : > { %v203_v21 = vmul.f32 %v202_v15, %v197_v11  ;;  %v222_v23 = vmul.f32 %v221_v17, %v216_v13 }
  0x96   : > { %v206_v19 = vpop.permute.xlu0 %205  ;;  %v226_v20 = vpop.permute.xlu1 %225 }
  0x97   : > { %v212_v22 = vmul.f32 %v211_v16, %v206_v19  ;;  %v232_v25 = vmul.f32 %v231_v18, %v226_v20 }
  0x99   : > { %v213_v24 = vadd.f32 %v212_v22, %v203_v21 }
  0x9b   : > { %v223_v26 = vadd.f32 %v222_v23, %v213_v24  ;;  %v237_v27 = vpop.permute.xlu1 %236 }
  0x9d   : > { %v233_v28 = vadd.f32 %v232_v25, %v223_v26 }
  0x9f   : > { %v701_v29 = vadd.f32 %v237_v27, %v233_v28 }
  0xa1   : > { %v243_v30 = vand.u32 2139095040, %v701_v29  ;;  %v240_v34 = vand.u32 2147483647, %v701_v29  ;;  %vm242_vm7 = vcmp.lt.s32.totalorder %v701_v29, 0  ;;  %vm332_vm13 = vweird.f32 %v701_v29 }
  0xa3   : > { %v244_v31 = vshrl.u32 %v243_v30, 23  ;;  %v247_v37 = vand.u32 8388607, %v240_v34  ;;  %vm241_vm8 = vcmp.le.f32.partialorder %v240_v34, 0.7853982 }
  0xa5   : > { %v439_v32 = vadd.s32 4294967169, %v244_v31  ;;  %v248_v56 = vor.u32 8388608, %v247_v37 }
  0xa7   : > { %v250_v33 = vadd.s32 1, %v439_v32  ;;  %v288_v6 = vshll.u32 %v248_v56, 8 }
  0xa9   : > { %vm251_vm0 = vcmp.gt.s32.totalorder %v250_v33, 0 }
  0xaa   : > { %v252_v35 = vsel %vm251_vm0, %v250_v33, 0 }
  0xab   : > { %v254_v36 = vand.u32 31, %v252_v35  ;;  %v253_v39 = vshrl.u32 %v252_v35, 5 }
  0xad   : > { %v255_v38 = vsub.s32 32, %v254_v36  ;;  %v257_v41 = vshll.u32 %v608_v40, %v254_v36  ;;  %v260_v43 = vshll.u32 %v609_v42, %v254_v36  ;;  %v263_v47 = vshll.u32 %v610_v45, %v254_v36 }
  0xae   : > { %v266_v50 = vshll.u32 %v611_v48, %v254_v36  ;;  %v269_v53 = vshll.u32 %v612_v51, %v254_v36  ;;  %vm272_vm1 = vcmp.lt.s32.totalorder %v253_v39, 1  ;;  %vm275_vm2 = vcmp.lt.s32.totalorder %v253_v39, 4 }
  0xaf   : > { %v258_v44 = vshrl.u32 %v609_v42, %v255_v38  ;;  %v261_v46 = vshrl.u32 %v610_v45, %v255_v38  ;;  %v264_v49 = vshrl.u32 %v611_v48, %v255_v38  ;;  %v267_v52 = vshrl.u32 %v612_v51, %v255_v38 }
  0xb0   : > { %v270_v55 = vshrl.u32 %v613_v54, %v255_v38  ;;  %v256_v1 = vshrl.u32 %v608_v40, %v255_v38  ;;  %vm274_vm3 = vcmp.lt.s32.totalorder %v253_v39, 3  ;;  %vm273_vm4 = vcmp.lt.s32.totalorder %v253_v39, 2 }
  0xb1   : > { %v259_v57 = vor.u32 %v258_v44, %v257_v41  ;;  %v262_v58 = vor.u32 %v261_v46, %v260_v43  ;;  %v265_v59 = vor.u32 %v264_v49, %v263_v47  ;;  %v268_v60 = vor.u32 %v267_v52, %v266_v50 }
  0xb2   : > { %v271_v61 = vor.u32 %v270_v55, %v269_v53 }
  0xb3   : > { %v277_v62 = vsel %vm275_vm2, %v265_v59, 2102212464  ;;  %v280_v63 = vsel %vm272_vm1, %v259_v57, %v262_v58  ;;  %v284_v0 = vsel %vm272_vm1, %v262_v58, %v265_v59  ;;  %v281_v2 = vsel %vm275_vm2, %v268_v60, 920167782 }
  0xb4   : > { %v285_v3 = vsel %vm275_vm2, %v271_v61, 1326507024  ;;  %v282_v4 = vsel %vm274_vm3, %v265_v59, %v281_v2  ;;  %v276_v7 = vsel %vm272_vm1, %v256_v1, %v259_v57  ;;  %v278_v8 = vsel %vm274_vm3, %v262_v58, %v277_v62 }
  0xb5   : > { %v286_v5 = vsel %vm274_vm3, %v268_v60, %v285_v3  ;;  %v283_v9 = vsel %vm273_vm4, %v280_v63, %v282_v4  ;;  %v279_v15 = vsel %vm273_vm4, %v276_v7, %v278_v8 }
  0xb6   : > { %v287_v10 = vsel %vm273_vm4, %v284_v0, %v286_v5  ;;  %v710_v13 = vmul.u32.u64.low %v288_v6, %v283_v9  ;;  %v711_v14 = vmul.u32.u64.high %v288_v6, %v283_v9, %v710_v13  ;;  %v295_v17 = vmul.u32 %v288_v6, %v279_v15 }
  0xb7   : > { %v707_v11 = vmul.u32.u64.low %v288_v6, %v287_v10  ;;  %v708_v12 = vmul.u32.u64.high %v288_v6, %v287_v10, %v707_v11 }
  0xb8   : > { %v298_v16 = vadd.s32 1, %v711_v14 }
  0xb9   : > { %vm297_vm5 = vc.u32 %v708_v12, %v710_v13  ;;  %v296_v30 = vadd.s32 %v710_v13, %v708_v12 }
  0xba   : > { %v299_v18 = vsel %vm297_vm5, %v298_v16, %v711_v14 }
  0xbb   : > { %v300_v19 = vadd.s32 %v299_v18, %v295_v17 }
  0xbd   : > { %v301_v20 = vadd.s32 536870912, %v300_v19 }
  0xbf   : > { %v302_v21 = vshrl.u32 %v301_v20, 30 }
  0xc1   : > { %v303_v22 = vshll.u32 %v302_v21, 30  ;;  %v326_v44 = vsub.s32 4, %v302_v21 }
  0xc3   : > { %v304_v23 = vsub.s32 %v300_v19, %v303_v22  ;;  %v327_v47 = vsel %vm242_vm7, %v326_v44, %v302_v21 }
  0xc4   : > { %v329_v48 = vsel %vm241_vm8, 0, %v327_v47 }
  0xc5   : > { %v306_v24 = vsub.s32 0, %v304_v23  ;;  %v333_v49 = vadd.s32 3, %v329_v48 }
  0xc7   : > { %v440_v25 = vmin.u32 %v306_v24, %v304_v23  ;;  %v334_v50 = vand.u32 3, %v333_v49 }
  0xc9   : > { %v308_v26 = vclz %v440_v25  ;;  %vm339_vm9 = vcmp.eq.s32.totalorder %v334_v50, 2  ;;  %vm336_vm10 = vcmp.eq.s32.totalorder %v334_v50, 0  ;;  %vm335_vm11 = vcmp.lt.s32.totalorder %v334_v50, 2 }
  0xcb   : > { %v441_v27 = vadd.s32 4294967294, %v308_v26 }
  0xcd   : > { %vm442_vm6 = vcmp.lt.s32.totalorder %v441_v27, 0 }
  0xce   : > { %v311_v28 = vsel %vm442_vm6, 0, %v441_v27 }
  0xcf   : > { %v312_v31 = vsub.s32 32, %v311_v28  ;;  %v316_v32 = vsub.s32 4294967266, %v311_v28  ;;  %v313_v33 = vshll.u32 %v304_v23, %v311_v28 }
  0xd1   : > { %v314_v35 = vshrl.u32 %v296_v30, %v312_v31  ;;  %v317_v36 = vadd.s32 127, %v316_v32 }
  0xd3   : > { %v315_v37 = vor.u32 %v314_v35, %v313_v33  ;;  %v318_v38 = vshll.u32 %v317_v36, 23 }
  0xd5   : > { %v319_v39 = vor.u32 4788187, %v318_v38  ;;  %v322_v41 = vcvt.s32.f32 %v315_v37 }
  0xd7   : > { %v320_v40 = vand.u32 2147483647, %v319_v39 }
  0xd9   : > { %v323_v42 = vmul.f32 %v322_v41, %v320_v40 }
  0xdb   : > { %v324_v43 = vxor.u32 2147483648, %v323_v42 }
  0xdd   : > { %v325_v45 = vsel %vm242_vm7, %v324_v43, %v323_v42 }
  0xde   : > { %v328_v46 = vsel %vm241_vm8, %v701_v29, %v325_v45 }
  0xdf   : > { %522 = vcosq.f32 %v328_v46 }
  0xe0   : > { %524 = vsinq.f32 %v328_v46 }
  0xec   : > { %v523_v51 = vpop.eup %522 }
  0xed   : > { %v525_v52 = vpop.eup %524  ;;  %v340_v53 = vxor.u32 2147483648, %v523_v51 }
  0xee   : > { %v337_v54 = vxor.u32 2147483648, %v525_v52 }
  0xef   : > { %v341_v34 = vsel %vm339_vm9, %v340_v53, %v525_v52 }
  0xf0   : > { %v338_v55 = vsel %vm336_vm10, %v523_v51, %v337_v54 }
  0xf1   : > { %v342_v56 = vsel %vm335_vm11, %v338_v55, %v341_v34 }
  0xf2   : > { %v343_v57 = vsel %vm332_vm13, nan, %v342_v56 }
  0xf3   : > { %345 = vst.msk [vmem:[%s183_s11] sm:$0xff] %vm344_vm12, %v343_v57 }
  0xf4   : > { %539 = shalt.err (!%p536_p5)
}
  0xf5   : > { %s540_s30 = scalar_lea.hbm %s727_s23, 128  ;;  %s544_s6 = scalar_lea.hbm %s770_s3, 256 }
  0xf6   : > { %p541_p6 = scmp.ne.s32.totalorder %s727_s23, %s540_s30  ;;  %p545_p10 = scmp.lt.s32.totalorder %s727_s23, %s770_s3 }
  0xf7   : > { %p546_p11 = scmp.lt.s32.totalorder %s544_s6, %s540_s30 }
  0xf8   : > { %p542_p7 = pnand %p541_p6, %p675_p4 }
  0xf9   : > { %p547_p12 = por %p546_p11, %p545_p10 }
  0xfa   : > { %p543_p9 = pneg %p542_p7 }
  0xfc   : > { %p548_p13 = pnand %p547_p12, %p543_p9 }
  0xfe   : > { %551 = shalt.err (!%p548_p13)
}
  0xff   : > { %451 = dma.vmem_to_hbm [thread:$0]  (%p675_p4), %s362_s18, 128, %s727_s23, %s347_s15  }
 0x100 PF: > { %p457_p0 = scmp.ge.s32.totalorder %s602_s17, 2  ;;  %s373_s9 = sand.u32 1, %s582_s12  }
 0x101   : > { %s374_s10 = scalar_lea.sflag [#allocation3], %s373_s9 }
 0x102   : > { %p454_p1 = pnand %p457_p0, %p682_p8 }
 0x104   : > { %p455_p2 = pneg %p454_p1 }
 0x106   : > { %577 = dma.done.wait (%p455_p2), %s374_s10, 128  }
 0x107   : > { %579 = vsyncadd (%p455_p2), %s374_s10, 4294967168  ;;  %s16_s17 = sadd.s32 1, %s602_s17   ;;  %s773_s12 = smov %s586_s13 }
 0x108   : > { %p13_p3 = scmp.ge.s32.totalorder %s16_s17, 4   ;;  %s774_s13 = smov %s590_s14 }
 0x109   : > { %s775_s14 = smov %s688_s25  ;;  %s776_s15 = smov %s598_s16 }
 0x10a   : > { %s777_s16 = smov %s779_s20  ;;  %15 = sbr.rel (!%p13_p3) target bundleno = 4 (0x4), region = 67 }
 0x10f   :  { %379 = vsyncpa [#allocation3], 1 }
 0x110   :  { %381 = vsyncpa [#allocation3 + $0x1], 1 }

</bundles_post_ra>
